<compile_context>
chip_gen: v7x
topology: tpu7x:2x2x1
jax: 0.10.0
libtpu: 0.0.40
codegen_flags: <defaults>
</compile_context>

<pallas_src>
import functools

import numpy as np
import jax
import jax.numpy as jnp
from jax import lax
from jax.experimental import pallas as pl
from jax.experimental.pallas import tpu as pltpu


# --------------------------------------------------------------------------
# Pallas kernel: single invocation, both branches.
# --------------------------------------------------------------------------
def _basic_block_kernel(ml_ref, mr_ref,
                        xa_ref, xg_ref,
                        wa0_ref, wa1_ref, wa2_ref, ba_ref,
                        wg0_ref, wg1_ref, wg2_ref, bg_ref,
                        oa_ref, og_ref, *, hw):
    """out = relu(W1@x + W0@left + W2@right + b) per branch.

    ml_ref/mr_ref : (1, H*W)          lane masks (valid-left / valid-right tap)
    x*_ref        : (N*Cin,  H*W)     input, NCHW flattened
    w*0/1/2_ref   : (N*Cout, N*Cin)   block-diagonal folded per-tap weights
    b*_ref        : (N*Cout, 1)       folded bias
    o*_ref        : (N*Cout, H*W)     output, NCHW flattened
    """
    ml = ml_ref[...]                                  # (1, HW)
    mr = mr_ref[...]                                  # (1, HW)

    def branch(x_ref, w0_ref, w1_ref, w2_ref, b_ref, o_ref):
        x = x_ref[...]                                # (N*Cin, HW)
        # Conv taps as lane rotations (XLU); masks implement the (0,1) zero
        # padding and stop bleed across H-row boundaries.
        left = pltpu.roll(x, shift=1, axis=1) * ml          # x[..., w-1]
        right = pltpu.roll(x, shift=hw - 1, axis=1) * mr    # x[..., w+1]

        y = jnp.dot(w1_ref[...], x, preferred_element_type=jnp.float32)
        y = y + jnp.dot(w0_ref[...], left, preferred_element_type=jnp.float32)
        y = y + jnp.dot(w2_ref[...], right, preferred_element_type=jnp.float32)
        y = y + b_ref[...]
        o_ref[...] = jnp.maximum(y, 0.0).astype(o_ref.dtype)

    branch(xa_ref, wa0_ref, wa1_ref, wa2_ref, ba_ref, oa_ref)
    branch(xg_ref, wg0_ref, wg1_ref, wg2_ref, bg_ref, og_ref)


# --------------------------------------------------------------------------
# Wrapper: one fused pallas_call, no grid (everything fits VMEM).
# --------------------------------------------------------------------------
def basic_block_b(x_acc, x_gyr, params_acc, params_gyr):
    """Pallas equivalent of BasicBlock_b.forward(x_acc, x_gyr) (NCHW in/out)."""
    assert x_acc.shape == x_gyr.shape
    N, c_in, H, W = x_acc.shape
    hw = H * W
    fa, fg = params_acc["folded"], params_gyr["folded"]
    c_out = fa["w1"].shape[0] // N

    # NCHW -> (N*Cin, H*W): free contiguous reshape, no copy pass.
    xa = x_acc.reshape(N * c_in, hw)
    xg = x_gyr.reshape(N * c_in, hw)

    # Trace-time constant lane masks (valid left / right neighbor per column).
    wpos = np.arange(hw) % W
    m_left = jnp.asarray((wpos != 0).astype(np.float32).reshape(1, hw))
    m_right = jnp.asarray((wpos != W - 1).astype(np.float32).reshape(1, hw))

    kernel = functools.partial(_basic_block_kernel, hw=hw)

    out_acc, out_gyr = pl.pallas_call(
        kernel,
        out_shape=(jax.ShapeDtypeStruct((N * c_out, hw), x_acc.dtype),
                   jax.ShapeDtypeStruct((N * c_out, hw), x_gyr.dtype)),
        # No grid / BlockSpecs: single step, whole (tiny) arrays in VMEM.
    )(m_left, m_right, xa, xg,
      fa["w0"], fa["w1"], fa["w2"], fa["b"],
      fg["w0"], fg["w1"], fg["w2"], fg["b"])

    # (N*Cout, H*W) -> NCHW: free reshape.
    return (out_acc.reshape(N, c_out, H, W), out_gyr.reshape(N, c_out, H, W))


# --------------------------------------------------------------------------
# Deterministic parameter construction (raw PyTorch-shaped + folded-for-kernel)
# --------------------------------------------------------------------------
def _make_bn(key, c):
    k1, k2, k3, k4 = jax.random.split(key, 4)
    gamma = 1.0 + 0.1 * jax.random.normal(k1, (c,), jnp.float32)
    beta = 0.1 * jax.random.normal(k2, (c,), jnp.float32)
    rmean = 0.1 * jax.random.normal(k3, (c,), jnp.float32)
    rvar = jnp.abs(1.0 + 0.1 * jax.random.normal(k4, (c,), jnp.float32))
    return dict(gamma=gamma, beta=beta, rmean=rmean, rvar=rvar)


def make_branch_params(key, in_c, out_c, n_batch, eps=1e-5):
    k_w, k_b, k_bn, k_scw, k_scb, k_scbn = jax.random.split(key, 6)
    raw = {
        "conv_w": 0.1 * jax.random.normal(k_w, (out_c, in_c, 1, 3), jnp.float32),
        "conv_b": 0.1 * jax.random.normal(k_b, (out_c,), jnp.float32),
        "bn": _make_bn(k_bn, out_c),
        "eps": eps,
    }
    if in_c != out_c:
        raw["sc_w"] = 0.1 * jax.random.normal(k_scw, (out_c, in_c, 1, 1),
                                              jnp.float32)
        raw["sc_b"] = 0.1 * jax.random.normal(k_scb, (out_c,), jnp.float32)
        raw["sc_bn"] = _make_bn(k_scbn, out_c)

    # Fold conv bias + eval-mode BN (and the shortcut) into per-tap weights.
    bn = raw["bn"]
    scale = bn["gamma"] / jnp.sqrt(bn["rvar"] + eps)            # (out_c,)
    shift = bn["beta"] + scale * (raw["conv_b"] - bn["rmean"])  # (out_c,)

    taps = raw["conv_w"][:, :, 0, :]                            # (out_c, in_c, 3)
    w0 = taps[:, :, 0] * scale[:, None]                         # acts on x[w-1]
    w1 = taps[:, :, 1] * scale[:, None]                         # acts on x[w]
    w2 = taps[:, :, 2] * scale[:, None]                         # acts on x[w+1]
    bias = shift

    if in_c != out_c:
        sbn = raw["sc_bn"]
        sc_scale = sbn["gamma"] / jnp.sqrt(sbn["rvar"] + eps)
        sc_shift = sbn["beta"] + sc_scale * (raw["sc_b"] - sbn["rmean"])
        w1 = w1 + raw["sc_w"][:, :, 0, 0] * sc_scale[:, None]   # 1x1 proj -> center
        bias = bias + sc_shift
    else:
        w1 = w1 + jnp.eye(in_c, dtype=w1.dtype)                 # identity shortcut

    # Fold the batch into the weights: block-diagonal kron(I_N, W_tap), so the
    # kernel runs whole-slab matmuls with no per-batch loop and no concats.
    eye_n = jnp.eye(n_batch, dtype=w1.dtype)
    folded = {
        "w0": jnp.kron(eye_n, w0),                              # (N*out_c, N*in_c)
        "w1": jnp.kron(eye_n, w1),
        "w2": jnp.kron(eye_n, w2),
        "b": jnp.tile(bias, (n_batch,)).reshape(n_batch * out_c, 1),
    }
    return {"raw": raw, "folded": folded}


# --------------------------------------------------------------------------
# Pure-JAX reference (eval-mode BN), for numerical verification.
# --------------------------------------------------------------------------
def _ref_branch(x, raw, in_c, out_c):
    eps = raw["eps"]

    def bn(y, p):
        return (p["gamma"][None, :, None, None]
                * (y - p["rmean"][None, :, None, None])
                / jnp.sqrt(p["rvar"] + eps)[None, :, None, None]
                + p["beta"][None, :, None, None])

    y = lax.conv_general_dilated(
        x, raw["conv_w"], window_strides=(1, 1), padding=((0, 0), (1, 1)),
        dimension_numbers=("NCHW", "OIHW", "NCHW"))
    y = bn(y + raw["conv_b"][None, :, None, None], raw["bn"])

    if in_c != out_c:
        s = lax.conv_general_dilated(
            x, raw["sc_w"], window_strides=(1, 1), padding=((0, 0), (0, 0)),
            dimension_numbers=("NCHW", "OIHW", "NCHW"))
        s = bn(s + raw["sc_b"][None, :, None, None], raw["sc_bn"])
    else:
        s = x
    return jnp.maximum(y + s, 0.0)


def _ref_basic_block(x_acc, x_gyr, p_acc, p_gyr, in_c, out_c):
    return (_ref_branch(x_acc, p_acc["raw"], in_c, out_c),
            _ref_branch(x_gyr, p_gyr["raw"], in_c, out_c))


# --------------------------------------------------------------------------
if __name__ == "__main__":
    key = jax.random.PRNGKey(0)
    k_xa, k_xg, k_pa, k_pg, k_pa2, k_pg2 = jax.random.split(key, 6)

    N, C_IN, H, W = 2, 4, 16, 16
    C_OUT = 8

    x_acc = jax.random.normal(k_xa, (N, C_IN, H, W), jnp.float32)
    x_gyr = jax.random.normal(k_xg, (N, C_IN, H, W), jnp.float32)

    fwd = jax.jit(basic_block_b)

    # Case 1: in_channels != out_channels -> projection (1x1 conv + BN) shortcut
    p_acc = make_branch_params(k_pa, C_IN, C_OUT, N)
    p_gyr = make_branch_params(k_pg, C_IN, C_OUT, N)
    out_acc, out_gyr = fwd(x_acc, x_gyr, p_acc, p_gyr)
    out_acc, out_gyr = jax.block_until_ready((out_acc, out_gyr))

    ref_acc, ref_gyr = _ref_basic_block(x_acc, x_gyr, p_acc, p_gyr, C_IN, C_OUT)
    assert out_acc.shape == (N, C_OUT, H, W) and out_gyr.shape == (N, C_OUT, H, W)
    assert jnp.allclose(out_acc, ref_acc, atol=2e-3, rtol=2e-3)
    assert jnp.allclose(out_gyr, ref_gyr, atol=2e-3, rtol=2e-3)

    # Case 2: in_channels == out_channels -> identity shortcut
    p_acc2 = make_branch_params(k_pa2, C_IN, C_IN, N)
    p_gyr2 = make_branch_params(k_pg2, C_IN, C_IN, N)
    out_acc2, out_gyr2 = fwd(x_acc, x_gyr, p_acc2, p_gyr2)
    out_acc2, out_gyr2 = jax.block_until_ready((out_acc2, out_gyr2))

    ref_acc2, ref_gyr2 = _ref_basic_block(x_acc, x_gyr, p_acc2, p_gyr2,
                                          C_IN, C_IN)
    assert jnp.allclose(out_acc2, ref_acc2, atol=2e-3, rtol=2e-3)
    assert jnp.allclose(out_gyr2, ref_gyr2, atol=2e-3, rtol=2e-3)

    print("KERNEL_OK")
</pallas_src>

<mosaic_0001>
module attributes {stable_mosaic.version = 11 : i64} {
  func.func @_basic_block_kernel(%arg0: memref<1x256xf32, #tpu.memory_space<vmem>>, %arg1: memref<1x256xf32, #tpu.memory_space<vmem>>, %arg2: memref<8x256xf32, #tpu.memory_space<vmem>>, %arg3: memref<8x256xf32, #tpu.memory_space<vmem>>, %arg4: memref<16x8xf32, #tpu.memory_space<vmem>>, %arg5: memref<16x8xf32, #tpu.memory_space<vmem>>, %arg6: memref<16x8xf32, #tpu.memory_space<vmem>>, %arg7: memref<16x1xf32, #tpu.memory_space<vmem>>, %arg8: memref<16x8xf32, #tpu.memory_space<vmem>>, %arg9: memref<16x8xf32, #tpu.memory_space<vmem>>, %arg10: memref<16x8xf32, #tpu.memory_space<vmem>>, %arg11: memref<16x1xf32, #tpu.memory_space<vmem>>, %arg12: memref<16x256xf32, #tpu.memory_space<vmem>>, %arg13: memref<16x256xf32, #tpu.memory_space<vmem>>) attributes {dimension_semantics = [], scalar_prefetch = 0 : i64, scratch_operands = 0 : i64, tpu.core_type = #tpu.core_type<tc>} {
    %c0 = arith.constant 0 : index
    %c0_0 = arith.constant 0 : index
    %0 = vector.load %arg0[%c0, %c0_0] : memref<1x256xf32, #tpu.memory_space<vmem>>, vector<1x256xf32>
    %c0_1 = arith.constant 0 : index
    %c0_2 = arith.constant 0 : index
    %1 = vector.load %arg1[%c0_1, %c0_2] : memref<1x256xf32, #tpu.memory_space<vmem>>, vector<1x256xf32>
    %c0_3 = arith.constant 0 : index
    %c0_4 = arith.constant 0 : index
    %2 = vector.load %arg2[%c0_3, %c0_4] : memref<8x256xf32, #tpu.memory_space<vmem>>, vector<8x256xf32>
    %c1_i32 = arith.constant 1 : i32
    %3 = tpu.dynamic_rotate %2 by %c1_i32 dim 1 : vector<8x256xf32>, i32 -> vector<8x256xf32>
    %4 = vector.broadcast %0 : vector<1x256xf32> to vector<8x256xf32>
    %5 = arith.mulf %3, %4 : vector<8x256xf32>
    %c255_i32 = arith.constant 255 : i32
    %6 = tpu.dynamic_rotate %2 by %c255_i32 dim 1 : vector<8x256xf32>, i32 -> vector<8x256xf32>
    %7 = vector.broadcast %1 : vector<1x256xf32> to vector<8x256xf32>
    %8 = arith.mulf %6, %7 : vector<8x256xf32>
    %c0_5 = arith.constant 0 : index
    %c0_6 = arith.constant 0 : index
    %9 = vector.load %arg5[%c0_5, %c0_6] : memref<16x8xf32, #tpu.memory_space<vmem>>, vector<16x8xf32>
    %cst = arith.constant dense<0.000000e+00> : vector<16x256xf32>
    %10 = tpu.matmul %9, %2, %cst {dimension_numbers = #tpu.dot_dimension_numbers<[1], [0], [0], [1], [0, 0, 1, 1], [], []>} : vector<16x8xf32>, vector<8x256xf32>, vector<16x256xf32> -> vector<16x256xf32>
    %c0_7 = arith.constant 0 : index
    %c0_8 = arith.constant 0 : index
    %11 = vector.load %arg4[%c0_7, %c0_8] : memref<16x8xf32, #tpu.memory_space<vmem>>, vector<16x8xf32>
    %cst_9 = arith.constant dense<0.000000e+00> : vector<16x256xf32>
    %12 = tpu.matmul %11, %5, %cst_9 {dimension_numbers = #tpu.dot_dimension_numbers<[1], [0], [0], [1], [0, 0, 1, 1], [], []>} : vector<16x8xf32>, vector<8x256xf32>, vector<16x256xf32> -> vector<16x256xf32>
    %13 = arith.addf %10, %12 : vector<16x256xf32>
    %c0_10 = arith.constant 0 : index
    %c0_11 = arith.constant 0 : index
    %14 = vector.load %arg6[%c0_10, %c0_11] : memref<16x8xf32, #tpu.memory_space<vmem>>, vector<16x8xf32>
    %cst_12 = arith.constant dense<0.000000e+00> : vector<16x256xf32>
    %15 = tpu.matmul %14, %8, %cst_12 {dimension_numbers = #tpu.dot_dimension_numbers<[1], [0], [0], [1], [0, 0, 1, 1], [], []>} : vector<16x8xf32>, vector<8x256xf32>, vector<16x256xf32> -> vector<16x256xf32>
    %16 = arith.addf %13, %15 : vector<16x256xf32>
    %c0_13 = arith.constant 0 : index
    %c0_14 = arith.constant 0 : index
    %17 = vector.load %arg7[%c0_13, %c0_14] : memref<16x1xf32, #tpu.memory_space<vmem>>, vector<16x1xf32>
    %18 = vector.broadcast %17 : vector<16x1xf32> to vector<16x256xf32>
    %19 = arith.addf %16, %18 : vector<16x256xf32>
    %cst_15 = arith.constant 0.000000e+00 : f32
    %20 = vector.broadcast %cst_15 : f32 to vector<16x256xf32>
    %21 = arith.maximumf %19, %20 : vector<16x256xf32>
    %c0_16 = arith.constant 0 : index
    %c0_17 = arith.constant 0 : index
    %22 = vector.load %arg12[%c0_16, %c0_17] : memref<16x256xf32, #tpu.memory_space<vmem>>, vector<16x256xf32>
    tpu.vector_store %arg12[%c0_16, %c0_17], %21 {strides = array<i32>} : memref<16x256xf32, #tpu.memory_space<vmem>>, vector<16x256xf32>,
    %c0_18 = arith.constant 0 : index
    %c0_19 = arith.constant 0 : index
    %23 = vector.load %arg3[%c0_18, %c0_19] : memref<8x256xf32, #tpu.memory_space<vmem>>, vector<8x256xf32>
    %c1_i32_20 = arith.constant 1 : i32
    %24 = tpu.dynamic_rotate %23 by %c1_i32_20 dim 1 : vector<8x256xf32>, i32 -> vector<8x256xf32>
    %25 = vector.broadcast %0 : vector<1x256xf32> to vector<8x256xf32>
    %26 = arith.mulf %24, %25 : vector<8x256xf32>
    %c255_i32_21 = arith.constant 255 : i32
    %27 = tpu.dynamic_rotate %23 by %c255_i32_21 dim 1 : vector<8x256xf32>, i32 -> vector<8x256xf32>
    %28 = vector.broadcast %1 : vector<1x256xf32> to vector<8x256xf32>
    %29 = arith.mulf %27, %28 : vector<8x256xf32>
    %c0_22 = arith.constant 0 : index
    %c0_23 = arith.constant 0 : index
    %30 = vector.load %arg9[%c0_22, %c0_23] : memref<16x8xf32, #tpu.memory_space<vmem>>, vector<16x8xf32>
    %cst_24 = arith.constant dense<0.000000e+00> : vector<16x256xf32>
    %31 = tpu.matmul %30, %23, %cst_24 {dimension_numbers = #tpu.dot_dimension_numbers<[1], [0], [0], [1], [0, 0, 1, 1], [], []>} : vector<16x8xf32>, vector<8x256xf32>, vector<16x256xf32> -> vector<16x256xf32>
    %c0_25 = arith.constant 0 : index
    %c0_26 = arith.constant 0 : index
    %32 = vector.load %arg8[%c0_25, %c0_26] : memref<16x8xf32, #tpu.memory_space<vmem>>, vector<16x8xf32>
    %cst_27 = arith.constant dense<0.000000e+00> : vector<16x256xf32>
    %33 = tpu.matmul %32, %26, %cst_27 {dimension_numbers = #tpu.dot_dimension_numbers<[1], [0], [0], [1], [0, 0, 1, 1], [], []>} : vector<16x8xf32>, vector<8x256xf32>, vector<16x256xf32> -> vector<16x256xf32>
    %34 = arith.addf %31, %33 : vector<16x256xf32>
    %c0_28 = arith.constant 0 : index
    %c0_29 = arith.constant 0 : index
    %35 = vector.load %arg10[%c0_28, %c0_29] : memref<16x8xf32, #tpu.memory_space<vmem>>, vector<16x8xf32>
    %cst_30 = arith.constant dense<0.000000e+00> : vector<16x256xf32>
    %36 = tpu.matmul %35, %29, %cst_30 {dimension_numbers = #tpu.dot_dimension_numbers<[1], [0], [0], [1], [0, 0, 1, 1], [], []>} : vector<16x8xf32>, vector<8x256xf32>, vector<16x256xf32> -> vector<16x256xf32>
    %37 = arith.addf %34, %36 : vector<16x256xf32>
    %c0_31 = arith.constant 0 : index
    %c0_32 = arith.constant 0 : index
    %38 = vector.load %arg11[%c0_31, %c0_32] : memref<16x1xf32, #tpu.memory_space<vmem>>, vector<16x1xf32>
    %39 = vector.broadcast %38 : vector<16x1xf32> to vector<16x256xf32>
    %40 = arith.addf %37, %39 : vector<16x256xf32>
    %cst_33 = arith.constant 0.000000e+00 : f32
    %41 = vector.broadcast %cst_33 : f32 to vector<16x256xf32>
    %42 = arith.maximumf %40, %41 : vector<16x256xf32>
    %c0_34 = arith.constant 0 : index
    %c0_35 = arith.constant 0 : index
    %43 = vector.load %arg13[%c0_34, %c0_35] : memref<16x256xf32, #tpu.memory_space<vmem>>, vector<16x256xf32>
    tpu.vector_store %arg13[%c0_34, %c0_35], %42 {strides = array<i32>} : memref<16x256xf32, #tpu.memory_space<vmem>>, vector<16x256xf32>,
    return
  }
}

</mosaic_0001>

<bundles_post_ra>
// kernel: basic_block_b.1
= control target key start
LH: loop header
LB: loop body
LE: loop exit
PB: predicated region body
PF: predicated region fallthrough
CT: control target
= control target key end

     0   :  { %v716_v2 = vmov 0.0   ;;  %s717_s29 = smov 1   ;;  %s718_s17 = smov 127   ;;  %v719_v5 = vmov 0   ;;  %v51_v10 = vlaneseq  ;;  %vm93_vm2 = vcmask 64512   ;;  %s923_s3 = inlined_call_operand.vmem [shape: f32[8,256], index: 3, kind: input, shape index: {}]   ;;  %s924_s2 = inlined_call_operand.vmem [shape: f32[8,256], index: 2, kind: input, shape index: {}]   ;;  %s925_s7 = inlined_call_operand.vmem [shape: f32[16,1], index: 7, kind: input, shape index: {}]   ;;  %s926_s11 = inlined_call_operand.vmem [shape: f32[16,1], index: 11, kind: input, shape index: {}]   ;;  %s927_s0 = inlined_call_operand.vmem [shape: f32[1,256], index: 0, kind: input, shape index: {}]   ;;  %s928_s1 = inlined_call_operand.vmem [shape: f32[1,256], index: 1, kind: input, shape index: {}]   ;;  %s929_s4 = inlined_call_operand.vmem [shape: f32[16,8], index: 4, kind: input, shape index: {}]   ;;  %s930_s8 = inlined_call_operand.vmem [shape: f32[16,8], index: 8, kind: input, shape index: {}]   ;;  %s931_s5 = inlined_call_operand.vmem [shape: f32[16,8], index: 5, kind: input, shape index: {}]   ;;  %s932_s9 = inlined_call_operand.vmem [shape: f32[16,8], index: 9, kind: input, shape index: {}]   ;;  %s933_s6 = inlined_call_operand.vmem [shape: f32[16,8], index: 6, kind: input, shape index: {}]   ;;  %s934_s10 = inlined_call_operand.vmem [shape: f32[16,8], index: 10, kind: input, shape index: {}]   ;;  %s935_s12 = inlined_call_operand.vmem [shape: f32[16,256], index: 12, kind: output, shape index: {0}]   ;;  %s936_s13 = inlined_call_operand.vmem [shape: f32[16,256], index: 13, kind: output, shape index: {1}]  }
   0x1   :  { %v793_v0 = vld [vmem:[%s923_s3] sm:$0xff]  ;;  %164 = vmatprep.mubr.f32.mxu0 %v716_v2  ;;  %465 = vmatprep.mubr.f32.mxu1 %v716_v2  ;;  %v807_v3 = vld [vmem:[%s923_s3 + $0x8] sm:$0xff] }
   0x2   :  { %v798_v1 = vld [vmem:[%s924_s2] sm:$0xff]  ;;  %375 = vrot.lane.b32.xlu1 %v793_v0, %s717_s29  ;;  %v46_v4 = vld [vmem:[%s924_s2 + $0x8] sm:$0xff]  ;;  %714 = vset.pattern.permute.xlu0 %v719_v5  ;;  %v58_v11 = vshrl.u32 %v51_v10, 7  ;;  %v52_v12 = vand.u32 127, %v51_v10 }
   0x3   :  { %47 = vrot.lane.b32.xlu0 %v798_v1, %s717_s29  ;;  %715 = vset.pattern.permute.xlu1 %v719_v5  ;;  %v350_v6 = vld [vmem:[%s925_s7 + $0x8] sm:$0xff]  ;;  %v349_v7 = vld [vmem:[%s925_s7] sm:$0xff] }
   0x4   :  { %v650_v8 = vld [vmem:[%s926_s11] sm:$0xff]  ;;  %v651_v9 = vld [vmem:[%s926_s11 + $0x8] sm:$0xff]  ;;  %v63_v13 = vsub.s32 1, %v58_v11  ;;  %v59_v14 = vsub.s32 0, %v58_v11  ;;  %vm53_vm0 = vcmp.lt.s32.totalorder %v52_v12, 1  ;;  %vm73_vm1 = vcmp.lt.s32.totalorder %v52_v12, 127 }
   0x5   :  { %v43_v15 = vld [vmem:[%s927_s0] sm:$0x3]  ;;  %v92_v39 = vld [vmem:[%s929_s4 + $0x8] sm:$0xff] }
   0x6   :  { %377 = vrot.lane.b32.xlu1 %v807_v3, %s717_s29  ;;  %v44_v18 = vld [vmem:[%s928_s1] sm:$0x3]  ;;  %v64_v19 = vrot.slane %v43_v15, %v63_v13  ;;  %v60_v20 = vrot.slane %v43_v15, %v59_v14  ;;  %v394_v43 = vld [vmem:[%s930_s8 + $0x8] sm:$0xff] }
   0x7   :  { %49 = vrot.lane.b32.xlu0 %v46_v4, %s717_s29  ;;  %v84_v23 = vrot.slane %v44_v18, %v63_v13  ;;  %v91_v32 = vld [vmem:[%s929_s4] sm:$0xff]  ;;  %v80_v38 = vrot.slane %v44_v18, %v59_v14  ;;  %v90_v51 = vld [vmem:[%s931_s5 + $0x8] sm:$0xff] }
   0x8   :  { %v393_v35 = vld [vmem:[%s930_s8] sm:$0xff]  ;;  %v392_v52 = vld [vmem:[%s932_s9 + $0x8] sm:$0xff] }
   0x9   :  { %v89_v48 = vld [vmem:[%s931_s5] sm:$0xff]  ;;  %v261_v55 = vld [vmem:[%s933_s6 + $0x8] sm:$0xff] }
   0xa   :  { %71 = vrot.lane.b32.xlu1 %v46_v4, %s718_s17  ;;  %v391_v50 = vld [vmem:[%s932_s9] sm:$0xff]  ;;  %v562_v56 = vld [vmem:[%s934_s10 + $0x8] sm:$0xff] }
   0xb   :  { %69 = vrot.lane.b32.xlu0 %v798_v1, %s718_s17  ;;  %v260_v53 = vld [vmem:[%s933_s6] sm:$0xff] }
   0xc   :  { %v561_v54 = vld [vmem:[%s934_s10] sm:$0xff] }
   0xe   :  { %385 = vrot.lane.b32.xlu1 %v807_v3, %s718_s17 }
   0xf   :  { %383 = vrot.lane.b32.xlu0 %v793_v0, %s718_s17 }
  0x12   :  { %358 = vperm.xlu1 %715, %v350_v6  }
  0x13   :  { %353 = vperm.xlu0 %714, %v349_v7  }
  0x16   :  { %654 = vperm.xlu1 %715, %v650_v8  }
  0x17   :  { %659 = vperm.xlu0 %714, %v651_v9  }
  0x74   :  { %v376_v16 = vpop.permute.xlu1 %375 }
  0x75   :  { %v48_v17 = vpop.permute.xlu0 %47 }
  0x78   :  { %v378_v21 = vpop.permute.xlu1 %377 }
  0x79   :  { %v50_v22 = vpop.permute.xlu0 %49  ;;  %v380_v24 = vsel %vm53_vm0, %v378_v21, %v376_v16  ;;  %v379_v27 = vsel %vm53_vm0, %v376_v16, %v378_v21 }
  0x7a   :  { %v55_v25 = vsel %vm53_vm0, %v50_v22, %v48_v17  ;;  %v54_v26 = vsel %vm53_vm0, %v48_v17, %v50_v22  ;;  %v382_v29 = vmul.f32 %v379_v27, %v64_v19  ;;  %v381_v31 = vmul.f32 %v380_v24, %v60_v20 }
  0x7b   :  { %v68_v28 = vmul.f32 %v64_v19, %v54_v26  ;;  %v67_v30 = vmul.f32 %v60_v20, %v55_v25 }
  0x7c   :  { %401 = vmatprep.subr.mxu1 %v382_v29  ;;  %v72_v33 = vpop.permute.xlu1 %71 }
  0x7d   :  { %100 = vmatprep.subr.mxu0 %v68_v28  ;;  %v70_v34 = vpop.permute.xlu0 %69  ;;  %402 = vmatpush1.msra.mxu1 %v381_v31 }
  0x7e   :  { %v75_v36 = vsel %vm73_vm1, %v72_v33, %v70_v34  ;;  %101 = vmatpush1.msra.mxu0 %v67_v30  ;;  %688 = vmatmul.mubr.msk.f32.vlgmr.msra.gmra.mrb[0].mxu1 %vm93_vm2, %v393_v35  ;;  %v74_v40 = vsel %vm73_vm1, %v70_v34, %v72_v33 }
  0x7f   :  { %v88_v37 = vmul.f32 %v84_v23, %v75_v36  ;;  %682 = vmatmul.mubr.msk.f32.vlgmr.msra.gmra.mrb[0].mxu0 %vm93_vm2, %v91_v32  ;;  %183 = vmatprep.subr.mxu0 %v46_v4  ;;  %v87_v47 = vmul.f32 %v80_v38, %v74_v40 }
  0x80   :  { %484 = vmatprep.subr.mxu1 %v807_v3  ;;  %184 = vmatpush1.msra.mxu0 %v798_v1  ;;  %v386_v41 = vpop.permute.xlu1 %385 }
  0x81   :  { %485 = vmatpush1.msra.mxu1 %v793_v0  ;;  %v384_v42 = vpop.permute.xlu0 %383  ;;  %170 = vmatprep.mubr.f32.mxu0 %v716_v2 }
  0x82   :  { %v387_v44 = vsel %vm73_vm1, %v384_v42, %v386_v41  ;;  %v388_v45 = vsel %vm73_vm1, %v386_v41, %v384_v42  ;;  %471 = vmatprep.mubr.f32.mxu1 %v716_v2  ;;  %268 = vmatprep.subr.mxu0 %v88_v37 }
  0x83   :  { %v390_v46 = vmul.f32 %v388_v45, %v84_v23  ;;  %683 = vmatmul.mubr.msk.f32.gmra.mrb[2].mxu0 %vm93_vm2, %v92_v39  ;;  %689 = vmatmul.mubr.msk.f32.gmra.mrb[2].mxu1 %vm93_vm2, %v394_v43  ;;  %v389_v49 = vmul.f32 %v387_v44, %v80_v38 }
  0x84   :  { %247 = vmatprep.mubr.f32.mxu0 %v716_v2  ;;  %548 = vmatprep.mubr.f32.mxu1 %v716_v2 }
  0x85   :  { %569 = vmatprep.subr.mxu1 %v390_v46 }
  0x87   :  { %684 = vmatmul.mubr.msk.f32.vlgmr.msra.gmra.mrb[0].mxu0 %vm93_vm2, %v89_v48  ;;  %690 = vmatmul.mubr.msk.f32.vlgmr.msra.gmra.mrb[0].mxu1 %vm93_vm2, %v391_v50 }
  0x88   :  { %269 = vmatpush1.msra.mxu0 %v87_v47  ;;  %570 = vmatpush1.msra.mxu1 %v389_v49 }
  0x89   :  { %253 = vmatprep.mubr.f32.mxu0 %v716_v2  ;;  %554 = vmatprep.mubr.f32.mxu1 %v716_v2 }
  0x8b   :  { %685 = vmatmul.mubr.msk.f32.gmra.mrb[2].mxu0 %vm93_vm2, %v90_v51  ;;  %691 = vmatmul.mubr.msk.f32.gmra.mrb[2].mxu1 %vm93_vm2, %v392_v52 }
  0x8c   :  { %332 = vmatprep.mubr.f32.mxu0 %v716_v2  ;;  %633 = vmatprep.mubr.f32.mxu1 %v716_v2 }
  0x8f   :  { %686 = vmatmul.mubr.msk.f32.vlgmr.msra.gmra.mrb[0].mxu0 %vm93_vm2, %v260_v53  ;;  %692 = vmatmul.mubr.msk.f32.vlgmr.msra.gmra.mrb[0].mxu1 %vm93_vm2, %v561_v54 }
  0x90   :  { %338 = vmatprep.mubr.f32.mxu0 %v716_v2  ;;  %639 = vmatprep.mubr.f32.mxu1 %v716_v2 }
  0x91   :  { %v359_v57 = vpop.permute.xlu1 %358 }
  0x92   :  { %v354_v58 = vpop.permute.xlu0 %353 }
  0x93   :  { %687 = vmatmul.mubr.msk.f32.gmra.mrb[2].mxu0 %vm93_vm2, %v261_v55  ;;  %693 = vmatmul.mubr.msk.f32.gmra.mrb[2].mxu1 %vm93_vm2, %v562_v56 }
  0x95   :  { %v655_v59 = vpop.permute.xlu1 %654 }
  0x96   :  { %v660_v7 = vpop.permute.xlu0 %659 }
 0x162   :  { %v334_v60 = vpop.f32.mrb[0].mxu0  ;;  %v635_v62 = vpop.f32.mrb[0].mxu1 }
 0x163   :  { %v361_v61 = vadd.f32 %v354_v58, %v334_v60  ;;  %v336_v63 = vpop.f32.mrb[1].mxu0  ;;  %v662_v0 = vadd.f32 %v655_v59, %v635_v62  ;;  %v637_v3 = vpop.f32.mrb[1].mxu1 }
 0x164   :  { %v362_v1 = vadd.f32 %v354_v58, %v336_v63  ;;  %v663_v2 = vadd.f32 %v655_v59, %v637_v3 }
 0x165   :  { %v365_v4 = vmax.f32 %v361_v61, 0.0  ;;  %v666_v5 = vmax.f32 %v662_v0, 0.0 }
 0x166   :  { %v366_v6 = vmax.f32 %v362_v1, 0.0  ;;  %v340_v8 = vpop.f32.mrb[2].mxu0  ;;  %v667_v9 = vmax.f32 %v663_v2, 0.0  ;;  %v641_v11 = vpop.f32.mrb[2].mxu1 }
 0x167   :  { %369 = vst [vmem:[%s935_s12] sm:$0xff] %v365_v4  ;;  %v363_v10 = vadd.f32 %v359_v57, %v340_v8  ;;  %v342_v12 = vpop.f32.mrb[3].mxu0  ;;  %670 = vst [vmem:[%s936_s13] sm:$0xff] %v666_v5  ;;  %v664_v13 = vadd.f32 %v660_v7, %v641_v11  ;;  %v643_v15 = vpop.f32.mrb[3].mxu1 }
 0x168   :  { %370 = vst [vmem:[%s935_s12 + $0x8] sm:$0xff] %v366_v6  ;;  %v364_v14 = vadd.f32 %v359_v57, %v342_v12  ;;  %671 = vst [vmem:[%s936_s13 + $0x8] sm:$0xff] %v667_v9  ;;  %v665_v17 = vadd.f32 %v660_v7, %v643_v15 }
 0x169   :  { %v367_v16 = vmax.f32 %v363_v10, 0.0  ;;  %v668_v18 = vmax.f32 %v664_v13, 0.0 }
 0x16a   :  { %v368_v19 = vmax.f32 %v364_v14, 0.0  ;;  %v669_v20 = vmax.f32 %v665_v17, 0.0 }
 0x16b   :  { %371 = vst [vmem:[%s935_s12 + $0x10] sm:$0xff] %v367_v16  ;;  %672 = vst [vmem:[%s936_s13 + $0x10] sm:$0xff] %v668_v18 }
 0x16c   :  { %372 = vst [vmem:[%s935_s12 + $0x18] sm:$0xff] %v368_v19  ;;  %673 = vst [vmem:[%s936_s13 + $0x18] sm:$0xff] %v669_v20 }

</bundles_post_ra>
